<compile_context>
chip_gen: v6e
topology: v6e:2x2x1
jax: 0.10.0
libtpu: 0.0.40
codegen_flags: <defaults>
</compile_context>

<pallas_src>
import functools

import jax
import jax.numpy as jnp
from jax.experimental import pallas as pl
from jax.experimental.pallas import tpu as pltpu

BN_EPS = 1e-5


def _conv_bn_relu_kernel(x1_ref, x2_ref, w1_ref, w2_ref, sb_ref, o_ref):
    # x1_ref, x2_ref : (C_in, TILE_M)  bf16   N-major activation tiles (two shifted paths)
    # w1_ref, w2_ref : (C_half, C_in)  bf16   resident 1x1x1 conv weights
    # sb_ref         : (C_out, 2)      f32    col0 = folded BN scale, col1 = folded bias
    # o_ref          : (C_out, TILE_M) f32    lane-dense output tile
    c_half = w1_ref.shape[0]
    sb = sb_ref[...]
    scale = sb[:, 0:1]                                    # (C_out, 1)
    bias = sb[:, 1:2]
    y1 = jnp.dot(w1_ref[...], x1_ref[...], preferred_element_type=jnp.float32)
    y2 = jnp.dot(w2_ref[...], x2_ref[...], preferred_element_type=jnp.float32)
    o_ref[:c_half, :] = jnp.maximum(y1 * scale[:c_half] + bias[:c_half], 0.0)
    o_ref[c_half:, :] = jnp.maximum(y2 * scale[c_half:] + bias[c_half:], 0.0)


def _round_up(x, m):
    return (x + m - 1) // m * m


def _choose_tiling(mn, target):
    """Pick (tile_m, n_tiles, m_padded): prefer a 128-multiple divisor of mn
    (no jnp.pad, no ragged tail); otherwise pad the tail of the slab."""
    mn_up = _round_up(mn, 128)
    target = max(128, min(_round_up(target, 128), mn_up))
    if mn % 128 == 0:
        t = target
        while t >= max(128, target // 2):      # accept at most a 2x smaller tile
            if mn % t == 0:
                return t, mn // t, mn
            t -= 128
    m_pad = _round_up(mn, target)
    return target, m_pad // target, m_pad


@functools.partial(jax.jit, static_argnames=("tile_m",))
def factorized_reduce(x, w1, w2, gamma, beta, *, tile_m=16384):
    """x: (N, C_in, D, H, W) f32.  w1/w2: (C_out//2, C_in).  Returns NCDHW f32."""
    N, C_in, D, H, W = x.shape
    C_half = w1.shape[0]
    C_out = 2 * C_half

    # Stride-2 1x1x1 conv sampling sites (layout glue left to XLA for now).
    x1 = x[:, :, ::2, ::2, ::2]                 # conv_1 path
    x2 = x[:, :, 1::2, 1::2, 1::2]              # conv_2 path (shifted by 1)
    assert x1.shape == x2.shape, "requires even spatial dims (as in LEAStereo)"
    Do, Ho, Wo = x1.shape[2:]
    Mn = Do * Ho * Wo                           # per-sample spatial sites
    M = N * Mn                                  # BatchNorm reduction count

    # N-major flattened activations, bf16 (free reshapes, no transpose / concat).
    x1b = x1.reshape(N, C_in, Mn).astype(jnp.bfloat16)
    x2b = x2.reshape(N, C_in, Mn).astype(jnp.bfloat16)
    w1b = w1.astype(jnp.bfloat16)
    w2b = w2.astype(jnp.bfloat16)

    # ---- BatchNorm batch statistics via moment algebra (XLA, fusable with the
    # bf16-cast producer): for y = w @ x,
    #   E[y]   = w @ sum_m(x) / M
    #   E[y^2] = diag(w @ (x x^T) @ w^T) / M
    def _moments(xb, wb):
        wf = wb.astype(jnp.float32)
        s = jnp.sum(xb, axis=(0, 2), dtype=jnp.float32)                     # (C_in,)
        # Gram over the minor (lane) axis -> MXU-friendly, no transpose needed.
        g = jax.lax.dot_general(xb, xb, (((2,), (2,)), ((0,), (0,))),
                                preferred_element_type=jnp.float32)          # (N, C_in, C_in)
        g = jnp.sum(g, axis=0)                                               # (C_in, C_in)
        mean = (wf @ s) / M                                                  # (C_half,)
        ey2 = jnp.sum((wf @ g) * wf, axis=1) / M                             # diag(w G w^T)/M
        return mean, ey2

    mean1, ey2_1 = _moments(x1b, w1b)
    mean2, ey2_2 = _moments(x2b, w2b)
    mean = jnp.concatenate([mean1, mean2])                                   # (C_out,)
    var = jnp.maximum(jnp.concatenate([ey2_1, ey2_2]) - mean * mean, 0.0)    # biased var
    scale = gamma * jax.lax.rsqrt(var + BN_EPS)
    bias = beta - mean * scale
    sb = jnp.stack([scale, bias], axis=1).astype(jnp.float32)                # (C_out, 2)

    # ---- Tiling over the per-sample spatial axis (lane axis).
    tile, n_tiles, m_pad = _choose_tiling(Mn, tile_m)
    if m_pad != Mn:
        # Ragged fallback only: zero columns give y = 0, are sliced off below,
        # and the statistics above already divided by the true M.
        pad = ((0, 0), (0, 0), (0, m_pad - Mn))
        x1b = jnp.pad(x1b, pad)
        x2b = jnp.pad(x2b, pad)

    # Per-step VMEM: two bf16 input tiles + f32 output tile (double-buffered) +
    # f32 accumulators; cap at 48 MiB so large tiles still fit v7x (64 MiB/TC).
    step_bytes = tile * (2 * C_in * 2 * 2 + C_out * 4 * 2 + C_out * 4)
    vmem_limit = int(min(max(32 * 1024 * 1024, 2 * step_bytes), 48 * 1024 * 1024))

    out_flat = pl.pallas_call(
        _conv_bn_relu_kernel,
        out_shape=jax.ShapeDtypeStruct((N, C_out, m_pad), jnp.float32),
        grid=(N, n_tiles),
        in_specs=[
            pl.BlockSpec((None, C_in, tile), lambda n, i: (n, 0, i)),
            pl.BlockSpec((None, C_in, tile), lambda n, i: (n, 0, i)),
            pl.BlockSpec((C_half, C_in), lambda n, i: (0, 0)),      # resident weights
            pl.BlockSpec((C_half, C_in), lambda n, i: (0, 0)),
            pl.BlockSpec((C_out, 2), lambda n, i: (0, 0)),          # folded BN scale/bias
        ],
        out_specs=pl.BlockSpec((None, C_out, tile), lambda n, i: (n, 0, i)),
        compiler_params=pltpu.CompilerParams(
            # Both axes independent: N*n_tiles steps shardable across the two
            # TensorCores on v7x (batch alone already gives >= 2 parallel steps).
            dimension_semantics=("parallel", "parallel"),
            vmem_limit_bytes=vmem_limit,
        ),
        # TODO(synk): if the output writeback DMA shows up exposed in a trace at
        # very large tiles, try pipeline_mode=pl.Buffered(3) on the input specs.
    )(x1b, x2b, w1b, w2b, sb)

    # N-major layout already matches NCDHW: free slice (no-op unless padded) + reshape.
    return out_flat[:, :, :Mn].reshape(N, C_out, Do, Ho, Wo)


def factorized_reduce_ref(x, w1, w2, gamma, beta):
    """Pure-JAX f32 reference mirroring the PyTorch forward (training-mode BN)."""
    x1 = x[:, :, ::2, ::2, ::2]
    x2 = x[:, :, 1::2, 1::2, 1::2]
    y1 = jnp.einsum('ncdhw,oc->nodhw', x1, w1)
    y2 = jnp.einsum('ncdhw,oc->nodhw', x2, w2)
    y = jnp.concatenate([y1, y2], axis=1)
    mean = jnp.mean(y, axis=(0, 2, 3, 4), keepdims=True)
    var = jnp.mean((y - mean) ** 2, axis=(0, 2, 3, 4), keepdims=True)
    y_hat = (y - mean) * jax.lax.rsqrt(var + BN_EPS)
    g = gamma.reshape(1, -1, 1, 1, 1)
    b = beta.reshape(1, -1, 1, 1, 1)
    return jnp.maximum(y_hat * g + b, 0.0)


if __name__ == "__main__":
    # Small shapes consistent with the module: 5D NCDHW input, even spatial dims.
    N, C_in, D, H, W = 2, 8, 8, 16, 16
    C_out = 16
    C_half = C_out // 2

    key = jax.random.PRNGKey(0)
    kx, k1, k2 = jax.random.split(key, 3)

    x = jax.random.normal(kx, (N, C_in, D, H, W), dtype=jnp.float32)

    # Conv3d weights (C_out//2, C_in, 1, 1, 1): kaiming_normal(mode='fan_out',
    # nonlinearity='relu') => std = sqrt(2 / fan_out), fan_out = C_half.
    std = (2.0 / C_half) ** 0.5
    w1 = std * jax.random.normal(k1, (C_half, C_in), dtype=jnp.float32)
    w2 = std * jax.random.normal(k2, (C_half, C_in), dtype=jnp.float32)

    # BatchNorm3d affine params per _initialize_weights: weight=1, bias=0.
    gamma = jnp.ones((C_out,), dtype=jnp.float32)
    beta = jnp.zeros((C_out,), dtype=jnp.float32)

    # tile_m=128 here so the per-sample slab (Do*Ho*Wo = 256) runs as 2 lane
    # tiles -> grid (2, 2), exercising the tiled path; production default 16384.
    out = factorized_reduce(x, w1, w2, gamma, beta, tile_m=128)
    out = jax.block_until_ready(out)

    ref = factorized_reduce_ref(x, w1, w2, gamma, beta)
    assert out.shape == (N, C_out, D // 2, H // 2, W // 2), out.shape
    # bf16 matmul inputs (f32 accumulation / BN fold) => loosened tolerance vs f32 ref.
    assert jnp.allclose(out, ref, rtol=4e-2, atol=4e-2), "mismatch vs reference"

    print("KERNEL_OK")
</pallas_src>

<mosaic_0001>
module attributes {stable_mosaic.version = 11 : i64} {
  func.func @_conv_bn_relu_kernel(%arg0: i32, %arg1: i32, %arg2: memref<1x8x128xbf16, #tpu.memory_space<vmem>>, %arg3: memref<1x8x128xbf16, #tpu.memory_space<vmem>>, %arg4: memref<8x8xbf16, #tpu.memory_space<vmem>>, %arg5: memref<8x8xbf16, #tpu.memory_space<vmem>>, %arg6: memref<16x2xf32, #tpu.memory_space<vmem>>, %arg7: memref<1x16x128xf32, #tpu.memory_space<vmem>>) attributes {dimension_semantics = [#tpu.dimension_semantics<parallel>, #tpu.dimension_semantics<parallel>], iteration_bounds = array<i64: 2, 2>, scalar_prefetch = 0 : i64, scratch_operands = 0 : i64, tpu.core_type = #tpu.core_type<tc>, window_params = [{transform_indices = @transform_0, window_bounds = array<i64: 1, 8, 128>}, {transform_indices = @transform_1, window_bounds = array<i64: 1, 8, 128>}, {pipeline_mode = #tpu.pipeline_mode<synchronous>, transform_indices = @transform_2, window_bounds = array<i64: 8, 8>}, {pipeline_mode = #tpu.pipeline_mode<synchronous>, transform_indices = @transform_3, window_bounds = array<i64: 8, 8>}, {pipeline_mode = #tpu.pipeline_mode<synchronous>, transform_indices = @transform_4, window_bounds = array<i64: 16, 2>}, {transform_indices = @transform_5, window_bounds = array<i64: 1, 16, 128>}]} {
    %c0 = arith.constant 0 : index
    %c0_0 = arith.constant 0 : index
    %0 = vector.load %arg6[%c0, %c0_0] : memref<16x2xf32, #tpu.memory_space<vmem>>, vector<16x2xf32>
    %1 = vector.extract_strided_slice %0 {offsets = [0, 0], sizes = [16, 1], strides = [1, 1]} : vector<16x2xf32> to vector<16x1xf32>
    %2 = vector.extract_strided_slice %0 {offsets = [0, 1], sizes = [16, 1], strides = [1, 1]} : vector<16x2xf32> to vector<16x1xf32>
    %c0_1 = arith.constant 0 : index
    %c0_2 = arith.constant 0 : index
    %3 = vector.load %arg4[%c0_1, %c0_2] : memref<8x8xbf16, #tpu.memory_space<vmem>>, vector<8x8xbf16>
    %c0_3 = arith.constant 0 : index
    %c0_4 = arith.constant 0 : index
    %c0_5 = arith.constant 0 : index
    %4 = vector.load %arg2[%c0_3, %c0_4, %c0_5] : memref<1x8x128xbf16, #tpu.memory_space<vmem>>, vector<1x8x128xbf16>
    %5 = vector.shape_cast %4 : vector<1x8x128xbf16> to vector<8x128xbf16>
    %cst = arith.constant dense<0.000000e+00> : vector<8x128xf32>
    %6 = tpu.matmul %3, %5, %cst {dimension_numbers = #tpu.dot_dimension_numbers<[1], [0], [0], [1], [0, 0, 1, 1], [], []>} : vector<8x8xbf16>, vector<8x128xbf16>, vector<8x128xf32> -> vector<8x128xf32>
    %c0_6 = arith.constant 0 : index
    %c0_7 = arith.constant 0 : index
    %7 = vector.load %arg5[%c0_6, %c0_7] : memref<8x8xbf16, #tpu.memory_space<vmem>>, vector<8x8xbf16>
    %c0_8 = arith.constant 0 : index
    %c0_9 = arith.constant 0 : index
    %c0_10 = arith.constant 0 : index
    %8 = vector.load %arg3[%c0_8, %c0_9, %c0_10] : memref<1x8x128xbf16, #tpu.memory_space<vmem>>, vector<1x8x128xbf16>
    %9 = vector.shape_cast %8 : vector<1x8x128xbf16> to vector<8x128xbf16>
    %cst_11 = arith.constant dense<0.000000e+00> : vector<8x128xf32>
    %10 = tpu.matmul %7, %9, %cst_11 {dimension_numbers = #tpu.dot_dimension_numbers<[1], [0], [0], [1], [0, 0, 1, 1], [], []>} : vector<8x8xbf16>, vector<8x128xbf16>, vector<8x128xf32> -> vector<8x128xf32>
    %11 = vector.extract_strided_slice %1 {offsets = [0, 0], sizes = [8, 1], strides = [1, 1]} : vector<16x1xf32> to vector<8x1xf32>
    %12 = vector.broadcast %11 : vector<8x1xf32> to vector<8x128xf32>
    %13 = arith.mulf %6, %12 : vector<8x128xf32>
    %14 = vector.extract_strided_slice %2 {offsets = [0, 0], sizes = [8, 1], strides = [1, 1]} : vector<16x1xf32> to vector<8x1xf32>
    %15 = vector.broadcast %14 : vector<8x1xf32> to vector<8x128xf32>
    %16 = arith.addf %13, %15 : vector<8x128xf32>
    %cst_12 = arith.constant 0.000000e+00 : f32
    %17 = vector.broadcast %cst_12 : f32 to vector<8x128xf32>
    %18 = arith.maximumf %16, %17 : vector<8x128xf32>
    %c0_13 = arith.constant 0 : index
    %c0_14 = arith.constant 0 : index
    %c0_15 = arith.constant 0 : index
    %19 = vector.load %arg7[%c0_13, %c0_14, %c0_15] : memref<1x16x128xf32, #tpu.memory_space<vmem>>, vector<1x8x128xf32>
    %20 = vector.shape_cast %19 : vector<1x8x128xf32> to vector<8x128xf32>
    %21 = vector.shape_cast %18 : vector<8x128xf32> to vector<1x8x128xf32>
    tpu.vector_store %arg7[%c0_13, %c0_14, %c0_15], %21 {strides = array<i32>} : memref<1x16x128xf32, #tpu.memory_space<vmem>>, vector<1x8x128xf32>,
    %22 = vector.extract_strided_slice %1 {offsets = [8, 0], sizes = [8, 1], strides = [1, 1]} : vector<16x1xf32> to vector<8x1xf32>
    %23 = vector.broadcast %22 : vector<8x1xf32> to vector<8x128xf32>
    %24 = arith.mulf %10, %23 : vector<8x128xf32>
    %25 = vector.extract_strided_slice %2 {offsets = [8, 0], sizes = [8, 1], strides = [1, 1]} : vector<16x1xf32> to vector<8x1xf32>
    %26 = vector.broadcast %25 : vector<8x1xf32> to vector<8x128xf32>
    %27 = arith.addf %24, %26 : vector<8x128xf32>
    %cst_16 = arith.constant 0.000000e+00 : f32
    %28 = vector.broadcast %cst_16 : f32 to vector<8x128xf32>
    %29 = arith.maximumf %27, %28 : vector<8x128xf32>
    %c0_17 = arith.constant 0 : index
    %c8 = arith.constant 8 : index
    %c0_18 = arith.constant 0 : index
    %30 = vector.load %arg7[%c0_17, %c8, %c0_18] : memref<1x16x128xf32, #tpu.memory_space<vmem>>, vector<1x8x128xf32>
    %31 = vector.shape_cast %30 : vector<1x8x128xf32> to vector<8x128xf32>
    %32 = vector.shape_cast %29 : vector<8x128xf32> to vector<1x8x128xf32>
    tpu.vector_store %arg7[%c0_17, %c8, %c0_18], %32 {strides = array<i32>} : memref<1x16x128xf32, #tpu.memory_space<vmem>>, vector<1x8x128xf32>,
    return
  }
  func.func @transform_0(%arg0: i32, %arg1: i32) -> (i32, i32, i32) {
    %c0_i32 = arith.constant 0 : i32
    %c0_i32_0 = arith.constant 0 : i32
    return %arg0, %c0_i32, %arg1 : i32, i32, i32
  }
  func.func @transform_1(%arg0: i32, %arg1: i32) -> (i32, i32, i32) {
    %c0_i32 = arith.constant 0 : i32
    %c0_i32_0 = arith.constant 0 : i32
    return %arg0, %c0_i32, %arg1 : i32, i32, i32
  }
  func.func @transform_2(%arg0: i32, %arg1: i32) -> (i32, i32) {
    %c0_i32 = arith.constant 0 : i32
    %c0_i32_0 = arith.constant 0 : i32
    %c0_i32_1 = arith.constant 0 : i32
    return %c0_i32, %c0_i32_0 : i32, i32
  }
  func.func @transform_3(%arg0: i32, %arg1: i32) -> (i32, i32) {
    %c0_i32 = arith.constant 0 : i32
    %c0_i32_0 = arith.constant 0 : i32
    %c0_i32_1 = arith.constant 0 : i32
    return %c0_i32, %c0_i32_0 : i32, i32
  }
  func.func @transform_4(%arg0: i32, %arg1: i32) -> (i32, i32) {
    %c0_i32 = arith.constant 0 : i32
    %c0_i32_0 = arith.constant 0 : i32
    %c0_i32_1 = arith.constant 0 : i32
    return %c0_i32, %c0_i32_0 : i32, i32
  }
  func.func @transform_5(%arg0: i32, %arg1: i32) -> (i32, i32, i32) {
    %c0_i32 = arith.constant 0 : i32
    %c0_i32_0 = arith.constant 0 : i32
    return %arg0, %c0_i32, %arg1 : i32, i32, i32
  }
}

</mosaic_0001>

<bundles_post_ra>
// kernel: factorized_reduce.1
= control target key start
LH: loop header
LB: loop body
LE: loop exit
PB: predicated region body
PF: predicated region fallthrough
CT: control target
= control target key end

     0   :  { %s724_s18 = smov 0   ;;  %s726_s19 = smov 0   ;;  %s834_s0 = inlined_call_operand.vmem [shape: bf16[2,8,256], index: 0, kind: input, shape index: {}]   ;;  %s835_s1 = inlined_call_operand.vmem [shape: bf16[2,8,256], index: 1, kind: input, shape index: {}]   ;;  %s836_s2 = inlined_call_operand.vmem [shape: bf16[8,8], index: 2, kind: input, shape index: {}]   ;;  %s837_s3 = inlined_call_operand.vmem [shape: bf16[8,8], index: 3, kind: input, shape index: {}]   ;;  %s838_s4 = inlined_call_operand.vmem [shape: f32[16,2], index: 4, kind: input, shape index: {}]   ;;  %s839_s5 = inlined_call_operand.vmem [shape: f32[2,16,256], index: 5, kind: output, shape index: {}]  }
   0x1   :  { %s728_s20 = smov 0   ;;  %s730_s21 = smov 0  }
   0x2   :  { %s732_s22 = smov 0   ;;  %s734_s23 = smov 0  }
   0x3   :  { %s736_s24 = smov 0  }
   0x4 LB: > { %s24_s25 = sadd.s32 1, %s680_s22  ;;  %s27_s26 = sadd.s32 1, %s684_s23  ;;  %s688_s24 = sphi %s736_s24, %s15_s24   ;;  %s684_s23 = sphi %s734_s23, %s846_s23   ;;  %s680_s22 = sphi %s732_s22, %s845_s22   ;;  %s676_s21 = sphi %s730_s21, %s844_s21   ;;  %s672_s20 = sphi %s728_s20, %s843_s20   ;;  %s668_s19 = sphi %s726_s19, %s842_s19   ;;  %s664_s18 = sphi %s724_s18, %s841_s18  }
   0x5   : > { %p25_p0 = scmp.ge.s32.totalorder %s24_s25, 2  ;;  %s538_s27 = sadd.s32 4294967295, %s688_s24  }
   0x6   : > { %p165_p1 = scmp.ne.s32.totalorder %s668_s19, %s664_s18  ;;  %p166_p2 = scmp.eq.s32.totalorder %s538_s27, 3 }
   0x7   : > { %s848_s25 = smov (%p25_p0, %s24_s25), 0  ;;  %s850_s26 = smov (!%p25_p0, %s27_s26), %s684_s23 }
   0x8   : > { %s151_s28 = ssub.s32 %s680_s22, %s848_s25  ;;  %p29_p3 = scmp.ge.s32.totalorder %s850_s26, 2 }
   0x9   : > { %p542_p4 = scmp.ge.s32.totalorder %s688_s24, 1  ;;  %p770_p5 = por %p166_p2, %p165_p1 }
   0xa   : > { %p221_p6 = scmp.lt.s32.totalorder %s688_s24, 5  ;;  %s852_s26 = smov (%p29_p3, %s850_s26), 0 }
   0xb   : > { %s150_s30 = ssub.s32 %s684_s23, %s852_s26  ;;  %s155_s7 = sadd.s32 1, %s668_s19 }
   0xc   : > { %p222_p7 = pnand %p542_p4, %p221_p6  ;;  %s152_s6 = sor.u32 %s151_s28, %s150_s30 }
   0xd   : > { %p153_p8 = scmp.eq.s32.totalorder %s152_s6, 0  ;;  %p259_p9 = scmp.lt.s32.totalorder (!%p222_p7), %s676_s21, 1 }
   0xe   : > { %225 = sbr.rel (%p222_p7) target bundleno = 240 (0xf0), region = 40  ;;  %p261_p10 = scmp.lt.s32.totalorder (!%p222_p7), %s672_s20, 1 }
   0xf   : > { %s781_s8 = scalar_select %p153_p8, %s668_s19, %s155_s7  }
  0x13   : > { %v690_v0 = vmov 0.0   ;;  %v276_v1 = vld [vmem:[%s838_s4] sm:$0xff]  ;;  %s260_s11 = scalar_select %p259_p9, %s676_s21, 1  ;;  %vm691_vm0 = vmmov 0   ;;  %v692_v2 = vmov 0   ;;  %v693_v3 = vmov 1  }
  0x14   : > { %559 = vmatprep.subr.bf16.mxu0 %v690_v0  ;;  %565 = vmatprep.subr.bf16.mxu1 %v690_v0  ;;  %s262_s12 = scalar_select %p261_p10, %s672_s20, 1  ;;  %v277_v4 = vld [vmem:[%s838_s4 + $0x8] sm:$0xff]  ;;  %vm284_vm1 = vcmask 1043456   ;;  %v278_v9 = vld [vmem:[%s836_s2] sm:$0xf]  ;;  %vm280_vm2 = vcmask 64512  }
  0x15   : > { %561 = vmatprep.mubr.msk.bf16.mxu0 %vm691_vm0, %v690_v0  ;;  %567 = vmatprep.mubr.msk.bf16.mxu1 %vm691_vm0, %v690_v0  ;;  %s544_s13 = sshll.u32 %s260_s11, 1  ;;  %v328_v10 = vld [vmem:[%s837_s3] sm:$0xf] }
  0x16   : > { %631 = vset.pattern.permute.xlu0 %v692_v2  ;;  %632 = vset.pattern.permute.xlu1 %v693_v3  ;;  %s264_s14 = sadd.s32 %s544_s13, %s262_s12 }
  0x17   : > { %378 = vperm.xlu0 %631, %v276_v1   ;;  %383 = vperm.xlu1 %632, %v276_v1   ;;  %s545_s17 = sshll.u32 %s264_s14, 2  ;;  %s256_s14 = sand.u32 1, %s664_s18  }
  0x18   : > { %s266_s30 = scalar_lea.vmem %s834_s0, %s545_s17  ;;  %s274_s9 = scalar_lea.vmem %s835_s1, %s545_s17 }
  0x19   : > { %v279_v5 = vld [vmem:[%s266_s30] sm:$0xf]  ;;  %s543_s15 = sshll.u32 %s256_s14, 4  ;;  %s551_s18 = sshll.u32 (%p770_p5), %s676_s21, 2 }
  0x1a   : > { %v329_v6 = vld [vmem:[%s274_s9] sm:$0xf]  ;;  %v286_v7 = vsel %vm284_vm1, %v279_v5, 0  ;;  %s258_s16 = scalar_lea.vmem [#allocation2], %s543_s15  ;;  %s410_s17 = sadd.s32 (%p770_p5), %s672_s20, %s551_s18 }
  0x1b   : > { %391 = vperm.xlu0 %631, %v277_v4   ;;  %396 = vperm.xlu1 %632, %v277_v4   ;;  %v334_v8 = vsel %vm284_vm1, %v329_v6, 0  ;;  %s552_s27 = sshll.u32 (%p770_p5), %s410_s17, 3 }
  0x1c   : > { %560 = vmatpush3.bf16.msra.mxu0 %v286_v7  ;;  %566 = vmatpush3.bf16.msra.mxu1 %v334_v8  ;;  %s412_s6 = scalar_lea.vmem (%p770_p5), %s839_s5, %s552_s27 }
  0x1f   : > { %633 = vset.pattern.permute.xlu0 %v693_v3  ;;  %562 = vmatmul.mubr.msk.bf16.vlgmr.msra.gmra.mxu0 %vm280_vm2, %v278_v9 }
  0x20   : > { %568 = vmatmul.mubr.msk.bf16.vlgmr.msra.gmra.mxu1 %vm280_vm2, %v328_v10 }
  0x92   : > { %v379_v11 = vpop.permute.xlu0 %378  ;;  %v384_v12 = vpop.permute.xlu1 %383 }
  0x96   : > { %v392_v13 = vpop.permute.xlu0 %391  ;;  %v397_v16 = vpop.permute.xlu1 %396 }
  0xdf   : > { %v322_v14 = vpop.f32.mrf.mxu0 }
  0xe0   : > { %v370_v15 = vpop.f32.mrf.mxu1  ;;  %v381_v17 = vmul.f32 %v379_v11, %v322_v14 }
  0xe1   : > { %v394_v18 = vmul.f32 %v392_v13, %v370_v15  ;;  %v563_v19 = vpop.f32.mrf.mxu0 }
  0xe2   : > { %v569_v20 = vpop.f32.mrf.mxu1  ;;  %v386_v21 = vadd.f32 %v384_v12, %v381_v17 }
  0xe3   : > { %v399_v22 = vadd.f32 %v397_v16, %v394_v18  ;;  %v325_v23 = vpop.f32.mrf.mxu0  ;;  %408 = sbr.rel (!%p770_p5) target bundleno = 240 (0xf0), region = 44 }
  0xe4   : > { %v373_v24 = vpop.f32.mrf.mxu1  ;;  %v387_v25 = vmax.f32 %v386_v21, 0.0 }
  0xe5   : > { %v400_v26 = vmax.f32 %v399_v22, 0.0  ;;  %v564_v27 = vpop.f32.mrf.mxu0 }
  0xe6   : > { %v570_v28 = vpop.f32.mrf.mxu1  ;;  %388 = vst [vmem:[%s258_s16] sm:$0xff] %v387_v25 }
  0xe7   : > { %401 = vst [vmem:[%s258_s16 + $0x8] sm:$0xff] %v400_v26 }
  0xed   : > { %v443_v29 = vld [vmem:[%s258_s16] sm:$0xff] }
  0xee   : > { %v445_v30 = vld [vmem:[%s258_s16 + $0x8] sm:$0xff]  ;;  %444 = vst [vmem:[%s412_s6] sm:$0xff] %v443_v29 }
  0xef   : > { %446 = vst [vmem:[%s412_s6 + $0x10] sm:$0xff] %v445_v30 }
  0xf0 PF: > { %s15_s24 = sadd.s32 1, %s688_s24   ;;  %s841_s18 = smov %s668_s19 }
  0xf1   : > { %p12_p11 = scmp.ge.s32.totalorder %s15_s24, 6   ;;  %s842_s19 = smov %s781_s8 }
  0xf2   : > { %s843_s20 = smov %s680_s22  ;;  %s844_s21 = smov %s684_s23 }
  0xf3   : > { %s845_s22 = smov %s848_s25  ;;  %s846_s23 = smov %s852_s26 }
  0xf4   :  { %14 = sbr.rel (!%p12_p11) target bundleno = 4 (0x4), region = 111 }

</bundles_post_ra>
